<compile_context>
chip_gen: v7x
topology: tpu7x:2x2x1
jax: 0.10.0
libtpu: 0.0.40
codegen_flags: <defaults>
</compile_context>

<pallas_src>
import jax
import jax.numpy as jnp
from jax import lax
from jax.experimental import pallas as pl
from jax.experimental.pallas import tpu as pltpu

KH = KW = 3
STRIDE = 2
PAD = 1


def _conv_gemm_kernel(w_ref, xcol_ref, o_ref):
    # w_ref:    (O, K)  im2col-ordered weight, K = KH*KW*C
    # xcol_ref: (K, M)  im2col patches, M = N*OH*OW mapped to the lane axis
    # o_ref:    (O, M)  lane-dense output (M is a multiple of 128)
    o_ref[...] = jnp.dot(
        w_ref[...], xcol_ref[...],
        preferred_element_type=jnp.float32,
    ).astype(o_ref.dtype)


def first_block_conv(x_nchw, weight_oihw):
    """3x3 / stride-2 / pad-1 conv, bias=False. x: (N,C,H,W), w: (O,C,3,3)."""
    n, c, h, w = x_nchw.shape
    o = weight_oihw.shape[0]
    oh = (h + 2 * PAD - KH) // STRIDE + 1
    ow = (w + 2 * PAD - KW) // STRIDE + 1
    m = n * oh * ow
    k = KH * KW * c

    # ---- wrapper-side layout glue (XLA), deliberately kept out of the kernel ----
    # Keep NCHW (channels-first) so the flattened output-position axis ends up
    # last / lane-dense. Pad spatial dims by 1.
    x_pad = jnp.pad(x_nchw, ((0, 0), (0, 0), (PAD, PAD), (PAD, PAD)))

    # im2col: for each of the 9 taps take its stride-2 window; pack rows as
    # (kh, kw, c) and columns as (n, oh, ow).
    taps = []
    for kh in range(KH):
        for kw in range(KW):
            t = lax.slice(
                x_pad,
                start_indices=(0, 0, kh, kw),
                limit_indices=(n, c,
                               kh + STRIDE * (oh - 1) + 1,
                               kw + STRIDE * (ow - 1) + 1),
                strides=(1, 1, STRIDE, STRIDE),
            )                                            # (N, C, OH, OW)
            taps.append(t)
    xcol = jnp.stack(taps, axis=0)                       # (9, N, C, OH, OW)
    xcol = xcol.transpose(0, 2, 1, 3, 4).reshape(k, m)   # (K, M)

    # (O, C, KH, KW) -> (O, KH, KW, C) -> (O, K): matches xcol row ordering.
    w_mat = jnp.transpose(weight_oihw, (0, 2, 3, 1)).reshape(o, k)

    # ---- Pallas kernel: one lane-dense MXU GEMM, single invocation ----
    out2d = pl.pallas_call(
        _conv_gemm_kernel,
        out_shape=jax.ShapeDtypeStruct((o, m), x_nchw.dtype),
        in_specs=[
            pl.BlockSpec(memory_space=pltpu.MemorySpace.VMEM),
            pl.BlockSpec(memory_space=pltpu.MemorySpace.VMEM),
        ],
        out_specs=pl.BlockSpec(memory_space=pltpu.MemorySpace.VMEM),
    )(w_mat, xcol)

    # (O, M) -> (O, N, OH, OW) -> (N, O, OH, OW)  (NCHW, matches PyTorch).
    return out2d.reshape(o, n, oh, ow).transpose(1, 0, 2, 3)


if __name__ == "__main__":
    # Shapes consistent with the module: batch=2, in_planes=4, spatial=16x16,
    # planes=8, stride=2  ->  output (2, 8, 8, 8).
    N, C_IN, H, W = 2, 4, 16, 16
    PLANES = 8

    key = jax.random.PRNGKey(0)
    kx, kw_ = jax.random.split(key)
    x = jax.random.normal(kx, (N, C_IN, H, W), dtype=jnp.float32)
    # Deterministic kaiming-like weight init, shape (O, C, 3, 3).
    fan_in = C_IN * KH * KW
    weight = jax.random.normal(kw_, (PLANES, C_IN, KH, KW),
                               dtype=jnp.float32) * (2.0 / fan_in) ** 0.5

    conv = jax.jit(first_block_conv)
    out = jax.block_until_ready(conv(x, weight))

    # Reference check with XLA's conv (NCHW / OIHW, stride 2, pad 1).
    ref = lax.conv_general_dilated(
        x, weight, window_strides=(STRIDE, STRIDE),
        padding=((PAD, PAD), (PAD, PAD)),
        dimension_numbers=("NCHW", "OIHW", "NCHW"))
    assert out.shape == (N, PLANES, H // STRIDE, W // STRIDE), out.shape
    assert jnp.allclose(out, ref, atol=1e-4, rtol=1e-4), \
        float(jnp.max(jnp.abs(out - ref)))

    print("KERNEL_OK")
</pallas_src>

<mosaic_0001>
module attributes {stable_mosaic.version = 11 : i64} {
  func.func @_conv_gemm_kernel(%arg0: memref<8x36xf32, #tpu.memory_space<vmem>>, %arg1: memref<36x128xf32, #tpu.memory_space<vmem>>, %arg2: memref<8x128xf32, #tpu.memory_space<vmem>>) attributes {dimension_semantics = [], scalar_prefetch = 0 : i64, scratch_operands = 0 : i64, tpu.core_type = #tpu.core_type<tc>} {
    %c0 = arith.constant 0 : index
    %c0_0 = arith.constant 0 : index
    %0 = vector.load %arg0[%c0, %c0_0] : memref<8x36xf32, #tpu.memory_space<vmem>>, vector<8x36xf32>
    %c0_1 = arith.constant 0 : index
    %c0_2 = arith.constant 0 : index
    %1 = vector.load %arg1[%c0_1, %c0_2] : memref<36x128xf32, #tpu.memory_space<vmem>>, vector<36x128xf32>
    %cst = arith.constant dense<0.000000e+00> : vector<8x128xf32>
    %2 = tpu.matmul %0, %1, %cst {dimension_numbers = #tpu.dot_dimension_numbers<[1], [0], [0], [1], [0, 0, 1, 1], [], []>} : vector<8x36xf32>, vector<36x128xf32>, vector<8x128xf32> -> vector<8x128xf32>
    %c0_3 = arith.constant 0 : index
    %c0_4 = arith.constant 0 : index
    %3 = vector.load %arg2[%c0_3, %c0_4] : memref<8x128xf32, #tpu.memory_space<vmem>>, vector<8x128xf32>
    tpu.vector_store %arg2[%c0_3, %c0_4], %2 {strides = array<i32>} : memref<8x128xf32, #tpu.memory_space<vmem>>, vector<8x128xf32>,
    return
  }
}

</mosaic_0001>

<bundles_post_ra>
// kernel: first_block_conv.1
= control target key start
LH: loop header
LB: loop body
LE: loop exit
PB: predicated region body
PF: predicated region fallthrough
CT: control target
= control target key end

     0   :  { %v130_v0 = vmov 0.0|0.0   ;;  %vm131_vm0 = vmmov 0   ;;  %v132_v4 = vmov 0.0   ;;  %vm21_vm1 = vcmask 1043456   ;;  %s169_s1 = inlined_call_operand.vmem [shape: f32[36,128], index: 1, kind: input, shape index: {}]   ;;  %s170_s0 = inlined_call_operand.vmem [shape: f32[8,36], index: 0, kind: input, shape index: {}]   ;;  %s171_s2 = inlined_call_operand.vmem [shape: f32[8,128], index: 2, kind: output, shape index: {}]  }
   0x1   :  { %121 = vmatprep.subr.bf16.mxu0 %v130_v0  ;;  %v12_v1 = vld [vmem:[%s169_s1] sm:$0xff]  ;;  %v13_v2 = vld [vmem:[%s169_s1 + $0x8] sm:$0xff]  ;;  %v14_v3 = vld [vmem:[%s169_s1 + $0x10] sm:$0xff]  ;;  %118 = vmatprep.mubr.msk.f32.mxu0 %vm131_vm0, %v132_v4  ;;  %vm17_vm2 = vcmask 293888  }
   0x2   :  { %v122_v5 = vpack.c.bf16 %v13_v2, %v12_v1  ;;  %v15_v6 = vld [vmem:[%s169_s1 + $0x18] sm:$0xff]  ;;  %v16_v8 = vld [vmem:[%s169_s1 + $0x20] sm:$0xf] }
   0x3   :  { %v125_v7 = vpack.c.bf16 %v15_v6, %v14_v3  ;;  %v11_v9 = vld [vmem:[%s170_s0] sm:$0xff] }
   0x4   :  { %123 = vmatpush3.bf16.msra.mxu0 %v122_v5 }
   0x5   :  { %124 = vmatprep.subr.bf16.mxu0 %v130_v0 }
   0x8   :  { %126 = vmatpush3.bf16.msra.mxu0 %v125_v7 }
   0x9   :  { %116 = vmatprep.subr.mxu0 %v132_v4 }
   0xc   :  { %117 = vmatpush3.msk.msra.mxu0 %vm21_vm1, %v16_v8 }
   0xd   :  { %119 = vmatmul.mubr.msk.f32.vlgmr.msra.gmra.mrb[0].mxu0 %vm17_vm2, %v11_v9 }
  0xe0   :  { %v91_v10 = vpop.f32.mrb[0].mxu0 }
  0xe1   :  { %95 = vst [vmem:[%s171_s2] sm:$0xff] %v91_v10  ;;  %v120_v11 = vpop.f32.mrb[1].mxu0 }

</bundles_post_ra>
